<compile_context>
chip_gen: v6e
topology: v6e:2x2x1
jax: 0.10.0
libtpu: 0.0.40
codegen_flags: <defaults>
</compile_context>

<pallas_src>
import jax
import jax.numpy as jnp
from jax.experimental import pallas as pl
from jax.experimental.pallas import tpu as pltpu

_NEG_BIG = -1e30       # plain Python float: lowers as an immediate, not a captured const
_OUT_SUBLANES = 8      # sublane-aligned output slab
_LANE = 128


def _gnn_kernel(counts_ref,                                   # SMEM [G] i32 (prefetch)
                a_ref, x_ref, w1_ref, b1_ref, w2_ref, b2_ref, # per-graph / weights
                wfc_ref, bfc_ref, out_ref):
    """One grid step processes one graph (padded to M nodes)."""
    g = pl.program_id(0)
    n_valid = counts_ref[g]                       # number of real nodes in this graph

    a = a_ref[...]                                # [M, M] bf16 normalized adjacency
    x = x_ref[...]                                # [M, F] bf16 node features

    # --- GCN layer 1: relu(A @ (X @ W1) + b1); bf16 MXU inputs, f32 accumulate ---
    y1 = jnp.dot(x, w1_ref[...], preferred_element_type=jnp.float32)          # [M, H]
    h1 = jnp.dot(a, y1.astype(jnp.bfloat16),
                 preferred_element_type=jnp.float32) + b1_ref[...]
    h1 = jnp.maximum(h1, 0.0)

    # --- GCN layer 2 ---
    y2 = jnp.dot(h1.astype(jnp.bfloat16), w2_ref[...],
                 preferred_element_type=jnp.float32)
    h2 = jnp.dot(a, y2.astype(jnp.bfloat16),
                 preferred_element_type=jnp.float32) + b2_ref[...]
    h2 = jnp.maximum(h2, 0.0)                                                  # [M, H]

    # --- global max pool over valid rows (padded rows masked to -1e30) ---
    row_ids = jax.lax.broadcasted_iota(jnp.int32, h2.shape, 0)
    pooled = jnp.max(jnp.where(row_ids < n_valid, h2, _NEG_BIG),
                     axis=0, keepdims=True)                                    # [1, H]

    # --- fc (class dim padded to 128 lanes; pad bias = -1e30) + log_softmax ---
    logits = jnp.dot(pooled, wfc_ref[...],
                     preferred_element_type=jnp.float32) + bfc_ref[...]        # [1, Cp]
    m = jnp.max(logits, axis=1, keepdims=True)
    shifted = logits - m
    lse = jnp.log(jnp.sum(jnp.exp(shifted), axis=1, keepdims=True))
    logp = shifted - lse                                                       # [1, Cp]

    out_ref[...] = jnp.broadcast_to(logp, out_ref.shape)   # lane-dense [8, Cp] store


def gcn_norm_dense(edge_index, num_nodes):
    """Dense D^{-1/2} (A + I) D^{-1/2}, as in torch_geometric GCNConv."""
    src = edge_index[0]
    dst = edge_index[1]
    a = jnp.zeros((num_nodes, num_nodes), jnp.float32).at[dst, src].set(1.0)
    a = a + jnp.eye(num_nodes, dtype=jnp.float32)
    # TODO(synk): assumes edge_index has no pre-existing self-loops (PyG's
    # add_remaining_self_loops would not double-count them).
    deg = jnp.sum(a, axis=1)
    d_inv_sqrt = jnp.where(deg > 0, jax.lax.rsqrt(deg), 0.0)
    return d_inv_sqrt[:, None] * a * d_inv_sqrt[None, :]


def pack_per_graph(x, edge_index, batch, num_graphs, max_nodes):
    """Plain-JAX glue: pack disjoint graphs into padded per-graph blocks.

    Returns a_pad [G,M,M] f32, x_pad [G,M,F] f32, counts [G] i32.
    """
    n = x.shape[0]
    a_norm = gcn_norm_dense(edge_index, n)                               # [N, N]

    one_hot = (batch[:, None] == jnp.arange(num_graphs)[None, :]).astype(jnp.int32)
    counts = jnp.sum(one_hot, axis=0).astype(jnp.int32)                  # [G]
    slot = (jnp.cumsum(one_hot, axis=0) - 1)[jnp.arange(n), batch]       # slot in graph

    idx = jnp.zeros((num_graphs, max_nodes), jnp.int32).at[batch, slot].set(
        jnp.arange(n, dtype=jnp.int32))                                  # [G, M]
    valid = jnp.zeros((num_graphs, max_nodes), jnp.bool_).at[batch, slot].set(True)

    x_pad = jnp.where(valid[..., None], x[idx], 0.0)                     # [G, M, F]
    a_pad = a_norm[idx[:, :, None], idx[:, None, :]]                     # [G, M, M]
    a_pad = jnp.where(valid[:, :, None] & valid[:, None, :], a_pad, 0.0)
    return a_pad, x_pad, counts


def net_forward(x, edge_index, batch, params, num_graphs, max_nodes):
    """Pallas-backed equivalent of Net.forward; returns [G, num_classes] log-probs."""
    w1, b1, w2, b2, wfc, bfc = params
    f_in, hidden = w1.shape
    num_classes = wfc.shape[1]
    c_pad = ((num_classes + _LANE - 1) // _LANE) * _LANE

    a_pad, x_pad, counts = pack_per_graph(x, edge_index, batch, num_graphs, max_nodes)

    # bf16 MXU inputs (halves DMA bytes, ~2x MXU rate on v6e/v7x); f32 accumulation.
    a_bf = a_pad.astype(jnp.bfloat16)
    x_bf = x_pad.astype(jnp.bfloat16)
    w1_bf = w1.astype(jnp.bfloat16)
    w2_bf = w2.astype(jnp.bfloat16)

    # Lane-dense classifier: zero weights / -1e30 bias in padded class columns so the
    # in-kernel log-softmax is unaffected by the padding.
    wfc_pad = jnp.zeros((hidden, c_pad), jnp.float32).at[:, :num_classes].set(wfc)
    bfc_pad = jnp.full((1, c_pad), _NEG_BIG, jnp.float32).at[:, :num_classes].set(bfc)

    m, f, h = max_nodes, f_in, hidden
    grid_spec = pltpu.PrefetchScalarGridSpec(
        num_scalar_prefetch=1,                 # counts -> SMEM
        grid=(num_graphs,),
        in_specs=[
            pl.BlockSpec((None, m, m), lambda g, c: (g, 0, 0)),   # A_g   (bf16)
            pl.BlockSpec((None, m, f), lambda g, c: (g, 0, 0)),   # X_g   (bf16)
            pl.BlockSpec((f, h), lambda g, c: (0, 0)),            # W1    (bf16)
            pl.BlockSpec((1, h), lambda g, c: (0, 0)),            # b1    (f32)
            pl.BlockSpec((h, h), lambda g, c: (0, 0)),            # W2    (bf16)
            pl.BlockSpec((1, h), lambda g, c: (0, 0)),            # b2    (f32)
            pl.BlockSpec((h, c_pad), lambda g, c: (0, 0)),        # Wfc   (f32, padded)
            pl.BlockSpec((1, c_pad), lambda g, c: (0, 0)),        # bfc   (f32, padded)
        ],
        out_specs=pl.BlockSpec((None, _OUT_SUBLANES, c_pad), lambda g, c: (g, 0, 0)),
    )

    out = pl.pallas_call(
        _gnn_kernel,
        out_shape=jax.ShapeDtypeStruct((num_graphs, _OUT_SUBLANES, c_pad), jnp.float32),
        grid_spec=grid_spec,
        compiler_params=pltpu.CompilerParams(
            dimension_semantics=("parallel",),          # graphs shard across TCs (v7x)
            vmem_limit_bytes=32 * 1024 * 1024),
    )(counts, a_bf, x_bf, w1_bf, b1, w2_bf, b2, wfc_pad, bfc_pad)

    return out[:, 0, :num_classes]


def init_params(key, num_features, hidden, num_classes):
    k1, k2, k3, k4, k5, k6 = jax.random.split(key, 6)
    w1 = jax.random.normal(k1, (num_features, hidden), jnp.float32) / jnp.sqrt(
        jnp.float32(num_features))
    b1 = 0.01 * jax.random.normal(k2, (1, hidden), jnp.float32)
    w2 = jax.random.normal(k3, (hidden, hidden), jnp.float32) / jnp.sqrt(
        jnp.float32(hidden))
    b2 = 0.01 * jax.random.normal(k4, (1, hidden), jnp.float32)
    wfc = jax.random.normal(k5, (hidden, num_classes), jnp.float32) / jnp.sqrt(
        jnp.float32(hidden))
    bfc = 0.01 * jax.random.normal(k6, (1, num_classes), jnp.float32)
    return (w1, b1, w2, b2, wfc, bfc)


if __name__ == "__main__":
    # Demo shapes (scaled down from the module defaults 2048/256 but kept lane-dense
    # and with >=128 matmul rows per grid step to fill the MXU).
    NUM_GRAPHS = 2
    NODES_PER_GRAPH = 128
    MAX_NODES = 128
    NUM_FEATURES = 256     # module default 2048
    HIDDEN = 128           # module default 256 (multiple of 128 -> lane-dense)
    NUM_CLASSES = 12

    N = NUM_GRAPHS * NODES_PER_GRAPH
    key = jax.random.PRNGKey(0)
    kx, kp = jax.random.split(key)

    x = jax.random.normal(kx, (N, NUM_FEATURES), jnp.float32)

    # Two undirected ring graphs of 128 nodes each (both edge directions).
    edges = []
    for g in range(NUM_GRAPHS):
        base = g * NODES_PER_GRAPH
        for i in range(NODES_PER_GRAPH):
            a_, b_ = base + i, base + (i + 1) % NODES_PER_GRAPH
            edges.append((a_, b_))
            edges.append((b_, a_))
    edge_index = jnp.array(edges, dtype=jnp.int32).T                  # [2, E]
    batch = jnp.repeat(jnp.arange(NUM_GRAPHS, dtype=jnp.int32), NODES_PER_GRAPH)

    params = init_params(kp, NUM_FEATURES, HIDDEN, NUM_CLASSES)

    out = net_forward(x, edge_index, batch, params, NUM_GRAPHS, MAX_NODES)
    out = jax.block_until_ready(out)

    # Sanity: rows of exp(log_softmax) must sum to 1.
    assert out.shape == (NUM_GRAPHS, NUM_CLASSES)
    row_sums = jnp.sum(jnp.exp(out), axis=1)
    assert bool(jnp.all(jnp.abs(row_sums - 1.0) < 1e-3))

    print("KERNEL_OK")
</pallas_src>

<mosaic_0001>
module attributes {stable_mosaic.version = 11 : i64} {
  func.func @_gnn_kernel(%arg0: i32, %arg1: memref<2xi32, #tpu.memory_space<smem>>, %arg2: memref<1x128x128xbf16, #tpu.memory_space<vmem>>, %arg3: memref<1x128x256xbf16, #tpu.memory_space<vmem>>, %arg4: memref<256x128xbf16, #tpu.memory_space<vmem>>, %arg5: memref<1x128xf32, #tpu.memory_space<vmem>>, %arg6: memref<128x128xbf16, #tpu.memory_space<vmem>>, %arg7: memref<1x128xf32, #tpu.memory_space<vmem>>, %arg8: memref<128x128xf32, #tpu.memory_space<vmem>>, %arg9: memref<1x128xf32, #tpu.memory_space<vmem>>, %arg10: memref<1x8x128xf32, #tpu.memory_space<vmem>>) attributes {dimension_semantics = [#tpu.dimension_semantics<parallel>], iteration_bounds = array<i64: 2>, scalar_prefetch = 1 : i64, scratch_operands = 0 : i64, tpu.core_type = #tpu.core_type<tc>, window_params = [{transform_indices = @transform_0, window_bounds = array<i64: 1, 128, 128>}, {transform_indices = @transform_1, window_bounds = array<i64: 1, 128, 256>}, {pipeline_mode = #tpu.pipeline_mode<synchronous>, transform_indices = @transform_2, window_bounds = array<i64: 256, 128>}, {pipeline_mode = #tpu.pipeline_mode<synchronous>, transform_indices = @transform_3, window_bounds = array<i64: 1, 128>}, {pipeline_mode = #tpu.pipeline_mode<synchronous>, transform_indices = @transform_4, window_bounds = array<i64: 128, 128>}, {pipeline_mode = #tpu.pipeline_mode<synchronous>, transform_indices = @transform_5, window_bounds = array<i64: 1, 128>}, {pipeline_mode = #tpu.pipeline_mode<synchronous>, transform_indices = @transform_6, window_bounds = array<i64: 128, 128>}, {pipeline_mode = #tpu.pipeline_mode<synchronous>, transform_indices = @transform_7, window_bounds = array<i64: 1, 128>}, {transform_indices = @transform_8, window_bounds = array<i64: 1, 8, 128>}]} {
    %0 = arith.index_cast %arg0 : i32 to index
    %1 = memref.load %arg1[%0] : memref<2xi32, #tpu.memory_space<smem>>
    %c0 = arith.constant 0 : index
    %c0_0 = arith.constant 0 : index
    %c0_1 = arith.constant 0 : index
    %2 = vector.load %arg2[%c0, %c0_0, %c0_1] : memref<1x128x128xbf16, #tpu.memory_space<vmem>>, vector<1x128x128xbf16>
    %3 = vector.shape_cast %2 : vector<1x128x128xbf16> to vector<128x128xbf16>
    %c0_2 = arith.constant 0 : index
    %c0_3 = arith.constant 0 : index
    %c0_4 = arith.constant 0 : index
    %4 = vector.load %arg3[%c0_2, %c0_3, %c0_4] : memref<1x128x256xbf16, #tpu.memory_space<vmem>>, vector<1x128x256xbf16>
    %5 = vector.shape_cast %4 : vector<1x128x256xbf16> to vector<128x256xbf16>
    %c0_5 = arith.constant 0 : index
    %c0_6 = arith.constant 0 : index
    %6 = vector.load %arg4[%c0_5, %c0_6] : memref<256x128xbf16, #tpu.memory_space<vmem>>, vector<256x128xbf16>
    %cst = arith.constant dense<0.000000e+00> : vector<128x128xf32>
    %7 = tpu.matmul %5, %6, %cst {dimension_numbers = #tpu.dot_dimension_numbers<[1], [0], [0], [1], [0, 0, 1, 1], [], []>} : vector<128x256xbf16>, vector<256x128xbf16>, vector<128x128xf32> -> vector<128x128xf32>
    %8 = arith.truncf %7 : vector<128x128xf32> to vector<128x128xbf16>
    %cst_7 = arith.constant dense<0.000000e+00> : vector<128x128xf32>
    %9 = tpu.matmul %3, %8, %cst_7 {dimension_numbers = #tpu.dot_dimension_numbers<[1], [0], [0], [1], [0, 0, 1, 1], [], []>} : vector<128x128xbf16>, vector<128x128xbf16>, vector<128x128xf32> -> vector<128x128xf32>
    %c0_8 = arith.constant 0 : index
    %c0_9 = arith.constant 0 : index
    %10 = vector.load %arg5[%c0_8, %c0_9] : memref<1x128xf32, #tpu.memory_space<vmem>>, vector<1x128xf32>
    %11 = vector.broadcast %10 : vector<1x128xf32> to vector<128x128xf32>
    %12 = arith.addf %9, %11 : vector<128x128xf32>
    %cst_10 = arith.constant 0.000000e+00 : f32
    %13 = vector.broadcast %cst_10 : f32 to vector<128x128xf32>
    %14 = arith.maximumf %12, %13 : vector<128x128xf32>
    %15 = arith.truncf %14 : vector<128x128xf32> to vector<128x128xbf16>
    %c0_11 = arith.constant 0 : index
    %c0_12 = arith.constant 0 : index
    %16 = vector.load %arg6[%c0_11, %c0_12] : memref<128x128xbf16, #tpu.memory_space<vmem>>, vector<128x128xbf16>
    %cst_13 = arith.constant dense<0.000000e+00> : vector<128x128xf32>
    %17 = tpu.matmul %15, %16, %cst_13 {dimension_numbers = #tpu.dot_dimension_numbers<[1], [0], [0], [1], [0, 0, 1, 1], [], []>} : vector<128x128xbf16>, vector<128x128xbf16>, vector<128x128xf32> -> vector<128x128xf32>
    %18 = arith.truncf %17 : vector<128x128xf32> to vector<128x128xbf16>
    %cst_14 = arith.constant dense<0.000000e+00> : vector<128x128xf32>
    %19 = tpu.matmul %3, %18, %cst_14 {dimension_numbers = #tpu.dot_dimension_numbers<[1], [0], [0], [1], [0, 0, 1, 1], [], []>} : vector<128x128xbf16>, vector<128x128xbf16>, vector<128x128xf32> -> vector<128x128xf32>
    %c0_15 = arith.constant 0 : index
    %c0_16 = arith.constant 0 : index
    %20 = vector.load %arg7[%c0_15, %c0_16] : memref<1x128xf32, #tpu.memory_space<vmem>>, vector<1x128xf32>
    %21 = vector.broadcast %20 : vector<1x128xf32> to vector<128x128xf32>
    %22 = arith.addf %19, %21 : vector<128x128xf32>
    %cst_17 = arith.constant 0.000000e+00 : f32
    %23 = vector.broadcast %cst_17 : f32 to vector<128x128xf32>
    %24 = arith.maximumf %22, %23 : vector<128x128xf32>
    %25 = tpu.iota {dimensions = array<i32: 0>} : vector<128x128xi32>
    %26 = vector.broadcast %1 : i32 to vector<128x128xi32>
    %27 = arith.cmpi slt, %25, %26 : vector<128x128xi32>
    %cst_18 = arith.constant -1.000000e+30 : f32
    %28 = vector.broadcast %cst_18 : f32 to vector<128x128xf32>
    %29 = arith.select %27, %24, %28 : vector<128x128xi1>, vector<128x128xf32>
    %cst_19 = arith.constant dense<0xFF800000> : vector<128xf32>
    %30 = vector.multi_reduction <maximumf>, %29, %cst_19 [0] : vector<128x128xf32> to vector<128xf32>
    %31 = vector.shape_cast %30 : vector<128xf32> to vector<1x128xf32>
    %c0_20 = arith.constant 0 : index
    %c0_21 = arith.constant 0 : index
    %32 = vector.load %arg8[%c0_20, %c0_21] : memref<128x128xf32, #tpu.memory_space<vmem>>, vector<128x128xf32>
    %cst_22 = arith.constant dense<0.000000e+00> : vector<1x128xf32>
    %33 = tpu.matmul %31, %32, %cst_22 {dimension_numbers = #tpu.dot_dimension_numbers<[1], [0], [0], [1], [0, 0, 1, 1], [], []>} : vector<1x128xf32>, vector<128x128xf32>, vector<1x128xf32> -> vector<1x128xf32>
    %c0_23 = arith.constant 0 : index
    %c0_24 = arith.constant 0 : index
    %34 = vector.load %arg9[%c0_23, %c0_24] : memref<1x128xf32, #tpu.memory_space<vmem>>, vector<1x128xf32>
    %35 = arith.addf %33, %34 : vector<1x128xf32>
    %cst_25 = arith.constant dense<0xFF800000> : vector<1xf32>
    %36 = vector.multi_reduction <maximumf>, %35, %cst_25 [1] : vector<1x128xf32> to vector<1xf32>
    %37 = vector.shape_cast %36 : vector<1xf32> to vector<1x1xf32>
    %38 = vector.broadcast %37 : vector<1x1xf32> to vector<1x128xf32>
    %39 = arith.subf %35, %38 : vector<1x128xf32>
    %40 = math.exp %39 : vector<1x128xf32>
    %cst_26 = arith.constant dense<0.000000e+00> : vector<1xf32>
    %41 = vector.multi_reduction <add>, %40, %cst_26 [1] : vector<1x128xf32> to vector<1xf32>
    %42 = vector.shape_cast %41 : vector<1xf32> to vector<1x1xf32>
    %43 = math.log %42 : vector<1x1xf32>
    %44 = vector.broadcast %43 : vector<1x1xf32> to vector<1x128xf32>
    %45 = arith.subf %39, %44 : vector<1x128xf32>
    %46 = vector.shape_cast %45 : vector<1x128xf32> to vector<1x128xf32>
    %47 = vector.broadcast %46 : vector<1x128xf32> to vector<8x128xf32>
    %c0_27 = arith.constant 0 : index
    %c0_28 = arith.constant 0 : index
    %c0_29 = arith.constant 0 : index
    %48 = vector.load %arg10[%c0_27, %c0_28, %c0_29] : memref<1x8x128xf32, #tpu.memory_space<vmem>>, vector<1x8x128xf32>
    %49 = vector.shape_cast %48 : vector<1x8x128xf32> to vector<8x128xf32>
    %50 = vector.shape_cast %47 : vector<8x128xf32> to vector<1x8x128xf32>
    tpu.vector_store %arg10[%c0_27, %c0_28, %c0_29], %50 {strides = array<i32>} : memref<1x8x128xf32, #tpu.memory_space<vmem>>, vector<1x8x128xf32>,
    return
  }
  func.func @transform_0(%arg0: i32, %arg1: memref<2xi32, #tpu.memory_space<smem>>) -> (i32, i32, i32) {
    %c0_i32 = arith.constant 0 : i32
    %c0_i32_0 = arith.constant 0 : i32
    %c0_i32_1 = arith.constant 0 : i32
    return %arg0, %c0_i32, %c0_i32_0 : i32, i32, i32
  }
  func.func @transform_1(%arg0: i32, %arg1: memref<2xi32, #tpu.memory_space<smem>>) -> (i32, i32, i32) {
    %c0_i32 = arith.constant 0 : i32
    %c0_i32_0 = arith.constant 0 : i32
    %c0_i32_1 = arith.constant 0 : i32
    return %arg0, %c0_i32, %c0_i32_0 : i32, i32, i32
  }
  func.func @transform_2(%arg0: i32, %arg1: memref<2xi32, #tpu.memory_space<smem>>) -> (i32, i32) {
    %c0_i32 = arith.constant 0 : i32
    %c0_i32_0 = arith.constant 0 : i32
    %c0_i32_1 = arith.constant 0 : i32
    return %c0_i32, %c0_i32_0 : i32, i32
  }
  func.func @transform_3(%arg0: i32, %arg1: memref<2xi32, #tpu.memory_space<smem>>) -> (i32, i32) {
    %c0_i32 = arith.constant 0 : i32
    %c0_i32_0 = arith.constant 0 : i32
    %c0_i32_1 = arith.constant 0 : i32
    return %c0_i32, %c0_i32_0 : i32, i32
  }
  func.func @transform_4(%arg0: i32, %arg1: memref<2xi32, #tpu.memory_space<smem>>) -> (i32, i32) {
    %c0_i32 = arith.constant 0 : i32
    %c0_i32_0 = arith.constant 0 : i32
    %c0_i32_1 = arith.constant 0 : i32
    return %c0_i32, %c0_i32_0 : i32, i32
  }
  func.func @transform_5(%arg0: i32, %arg1: memref<2xi32, #tpu.memory_space<smem>>) -> (i32, i32) {
    %c0_i32 = arith.constant 0 : i32
    %c0_i32_0 = arith.constant 0 : i32
    %c0_i32_1 = arith.constant 0 : i32
    return %c0_i32, %c0_i32_0 : i32, i32
  }
  func.func @transform_6(%arg0: i32, %arg1: memref<2xi32, #tpu.memory_space<smem>>) -> (i32, i32) {
    %c0_i32 = arith.constant 0 : i32
    %c0_i32_0 = arith.constant 0 : i32
    %c0_i32_1 = arith.constant 0 : i32
    return %c0_i32, %c0_i32_0 : i32, i32
  }
  func.func @transform_7(%arg0: i32, %arg1: memref<2xi32, #tpu.memory_space<smem>>) -> (i32, i32) {
    %c0_i32 = arith.constant 0 : i32
    %c0_i32_0 = arith.constant 0 : i32
    %c0_i32_1 = arith.constant 0 : i32
    return %c0_i32, %c0_i32_0 : i32, i32
  }
  func.func @transform_8(%arg0: i32, %arg1: memref<2xi32, #tpu.memory_space<smem>>) -> (i32, i32, i32) {
    %c0_i32 = arith.constant 0 : i32
    %c0_i32_0 = arith.constant 0 : i32
    %c0_i32_1 = arith.constant 0 : i32
    return %arg0, %c0_i32, %c0_i32_0 : i32, i32, i32
  }
}

</mosaic_0001>

<bundles_post_ra>
// kernel: tpu_custom_call.1
= control target key start
LH: loop header
LB: loop body
LE: loop exit
PB: predicated region body
PF: predicated region fallthrough
CT: control target
= control target key end

     0   :  { %s2241_s30 = smov [#allocation3]   ;;  %s2752_s0 = inlined_call_operand.hbm [shape: s32[2], index: 0, kind: input, shape index: {}]   ;;  %s2753_s1 = inlined_call_operand.hbm [shape: bf16[2,128,128], index: 1, kind: input, shape index: {}]   ;;  %s2754_s2 = inlined_call_operand.hbm [shape: bf16[2,128,256], index: 2, kind: input, shape index: {}]   ;;  %s2755_s3 = inlined_call_operand.hbm [shape: bf16[256,128], index: 3, kind: input, shape index: {}]   ;;  %s2756_s4 = inlined_call_operand.vmem [shape: f32[1,128], index: 4, kind: input, shape index: {}]   ;;  %s2757_s5 = inlined_call_operand.hbm [shape: bf16[128,128], index: 5, kind: input, shape index: {}]   ;;  %s2758_s6 = inlined_call_operand.vmem [shape: f32[1,128], index: 6, kind: input, shape index: {}]   ;;  %s2759_s7 = inlined_call_operand.hbm [shape: f32[128,128], index: 7, kind: input, shape index: {}]   ;;  %s2760_s8 = inlined_call_operand.vmem [shape: f32[1,128], index: 8, kind: input, shape index: {}]   ;;  %s2761_s9 = inlined_call_operand.hbm [shape: f32[2,8,128], index: 9, kind: output, shape index: {}]  }
   0x1   :  { %2770 = sst [smem:[#allocation22_spill]] %s2753_s1 }
   0x2   :  { %2771 = sst [smem:[#allocation23_spill]] %s2755_s3 }
   0x3   :  { %2772 = sst [smem:[#allocation24_spill]] %s2757_s5 }
   0x4   :  { %2773 = sst [smem:[#allocation25_spill]] %s2759_s7 }
   0x5   :  { %15 = dma.hbm_to_smem %s2752_s0, 16, %s2241_s30, [#allocation2] }
   0x6   :  { %2203 = dma.done.wait [#allocation2], 16 }
   0x7   :  { %2204 = vsyncadd [#allocation2], 4294967280 }
   0x8   :  { %17 = sfence }
   0x9   :  { %18 = vsyncpa [#allocation5], 0 }
   0xa   :  { %20 = vsyncpa [#allocation5 + $0x1], 0 }
   0xb   :  { %21 = vsyncpa [#allocation8], 0 }
   0xc   :  { %23 = vsyncpa [#allocation8 + $0x1], 0 }
   0xd   :  { %24 = vsyncpa [#allocation11], 0 }
   0xe   :  { %25 = vsyncpa [#allocation6], 0 }
   0xf   :  { %27 = vsyncpa [#allocation6 + $0x1], 0  ;;  %s2307_s12 = smov 0   ;;  %s2309_s13 = smov 0  }
  0x10   :  { %s2311_s14 = smov 0   ;;  %s2313_s15 = smov 0  }
  0x11 LB: > { %2774 = sst [smem:[#allocation20_spill]] %s2235_s14  ;;  %s2328_s0 = sadd.s32 4294967295, %s2239_s15   ;;  %s2239_s15 = sphi %s2313_s15, %s2804_s15   ;;  %s2235_s14 = sphi %s2311_s14, %s2801_s14   ;;  %s2231_s13 = sphi %s2309_s13, %s2803_s13   ;;  %s2227_s12 = sphi %s2307_s12, %s2802_s12  }
  0x12   : > { %s1535_s16 = sadd.s32 4294967294, %s2239_s15   ;;  %p53_p0 = scmp.ne.s32.totalorder %s2231_s13, %s2227_s12 }
  0x13   : > { %p2762_p1 = scmp.eq.s32.totalorder %s2328_s0, 0  ;;  %p229_p2 = scmp.eq.s32.totalorder %s2328_s0, 1 }
  0x14   : > { %p235_p3 = scmp.eq.s32.totalorder %s1535_s16, 1  ;;  %p1536_p5 = scmp.ge.s32.totalorder %s2239_s15, 1 }
  0x15   : > { %p2337_p4 = por %p2762_p1, %p53_p0  ;;  %p242_p7 = scmp.lt.s32.totalorder %s2239_s15, 3 }
  0x16   : > { %p2342_p6 = por %p235_p3, %p53_p0  ;;  %s2242_s20 = smov [#allocation9]  }
  0x17   : > { %s2775_s17 = scalar_select %p2337_p4, 1, 0 }
  0x18   : > { %s2776_s18 = scalar_select %p2342_p6, 1, 0 }
  0x19   : > { %p2347_p8 = pnand %p1536_p5, %p242_p7  ;;  %s254_s21 = sshll.u32 %s2242_s20, 4  ;;  %s255_s21 = int_to_ptr.vmem [resolvable:$true] %s254_s21 }
  0x1a   : > { %s2243_s23 = smov [#allocation10]   ;;  %s2244_s25 = smov [#allocation12]  }
  0x1b   : > { %p1888_p9 = pneg %p2347_p8  ;;  %s270_s24 = sshll.u32 %s2243_s23, 4  ;;  %s271_s24 = int_to_ptr.vmem [resolvable:$true] %s270_s24 }
  0x1c   : > { %s286_s26 = sshll.u32 %s2244_s25, 4  ;;  %s2038_s27 = scalar_lea.vmem %s255_s21, 2048  ;;  %s287_s26 = int_to_ptr.vmem [resolvable:$true] %s286_s26 }
  0x1d   : > { %p2356_p11 = pnand %p1888_p9, %p2762_p1  ;;  %p2039_p13 = scmp.ne.s32.totalorder %s255_s21, %s2038_s27 }
  0x1e   : > { %p2046_p5 = scmp.lt.s32.totalorder %s255_s21, %s255_s21  ;;  %p2047_p7 = scmp.lt.s32.totalorder %s2038_s27, %s2038_s27 }
  0x1f   : > { %p2029_p12 = pneg %p2356_p11 }
  0x20   : > { %p2048_p9 = por %p2047_p7, %p2046_p5 }
  0x21   : > { %p2041_p0 = pnand %p2039_p13, %p2029_p12 }
  0x23   : > { %p2042_p3 = pneg %p2041_p0 }
  0x25   : > { %p2049_p10 = pnand %p2048_p9, %p2042_p3 }
  0x27   : > { %2052 = shalt.err (!%p2049_p10)
}
  0x28   : > { %s2765_s28 = smov 64   ;;  %s2766_s29 = smov 4  }
  0x29   : > { %s2779_s3 = sld [smem:[#allocation23_spill]]  ;;  %s2064_s11 = scalar_lea.vmem %s271_s24, 1024 }
  0x2a   : > { %p2065_p13 = scmp.ne.s32.totalorder %s271_s24, %s2064_s11  ;;  %p2072_p3 = scmp.lt.s32.totalorder %s271_s24, %s271_s24 }
  0x2b   : > { %p2073_p10 = scmp.lt.s32.totalorder %s2064_s11, %s2064_s11 }
  0x2c   : > { %p2067_p0 = pnand %p2065_p13, %p2029_p12 }
  0x2d   : > { %p2074_p7 = por %p2073_p10, %p2072_p3 }
  0x2e   : > { %p2068_p5 = pneg %p2067_p0 }
  0x2f   : > { %1891 = dma.hbm_to_vmem [thread:$0]  (!%p2356_p11), %s2779_s3, 2048, %s255_s21, [#allocation8], %s2765_s28, %s2765_s28, %s2766_s29  }
  0x30   : > { %p2075_p9 = pnand %p2074_p7, %p2068_p5 }
  0x32   : > { %2078 = shalt.err (!%p2075_p9)
}
  0x33   : > { %s2780_s5 = sld [smem:[#allocation24_spill]]  ;;  %s2090_s21 = scalar_lea.vmem %s287_s26, 2048 }
  0x34   : > { %p2091_p1 = scmp.ne.s32.totalorder %s287_s26, %s2090_s21  ;;  %p2098_p3 = scmp.lt.s32.totalorder %s287_s26, %s287_s26 }
  0x35   : > { %p2099_p5 = scmp.lt.s32.totalorder %s2090_s21, %s2090_s21 }
  0x36   : > { %p2093_p13 = pnand %p2091_p1, %p2029_p12 }
  0x37   : > { %p2100_p10 = por %p2099_p5, %p2098_p3 }
  0x38   : > { %p2094_p0 = pneg %p2093_p13 }
  0x39   : > { %1894 = dma.hbm_to_vmem [thread:$0]  (!%p2356_p11), %s2780_s5, 1024, %s271_s24, [#allocation11], %s2765_s28, %s2765_s28, %s2766_s29  }
  0x3a   : > { %p2101_p7 = pnand %p2100_p10, %p2094_p0 }
  0x3c   : > { %2104 = shalt.err (!%p2101_p7)
}
  0x3d   : > { %s2763_s23 = smov 128   ;;  %s2764_s24 = smov 8  }
  0x3e   : > { %s2781_s7 = sld [smem:[#allocation25_spill]]  ;;  %s2396_s30 = sadd.s32 1, %s2239_s15  }
  0x3f   : > { %s37_s10 = ssub.s32 %s2239_s15, %s2396_s30  ;;  %s40_s11 = sadd.s32 1, %s2235_s14 }
  0x40   : > { %p38_p1 = scmp.eq.s32.totalorder %s37_s10, 0  ;;  %p47_p12 = scmp.ne.s32.totalorder %s2235_s14, %s2231_s13 }
  0x41   : > { %p48_p9 = scmp.eq.s32.totalorder %s2239_s15, 0  ;;  %p1912_p13 = scmp.lt.s32.totalorder %s2239_s15, 2 }
  0x42   : > { %s2406_s16 = scalar_select %p38_p1, %s2235_s14, %s40_s11  }
  0x43   : > { %p49_p0 = por %p48_p9, %p47_p12  ;;  %p2410_p3 = por %p229_p2, %p47_p12 }
  0x44   : > { %1897 = dma.hbm_to_vmem [thread:$0]  (!%p2356_p11), %s2781_s7, 2048, %s287_s26, [#allocation11], %s2763_s23, %s2763_s23, %s2764_s24  }
  0x45   : > { %2782 = sst [smem:[#allocation21_spill]] %s2406_s16  ;;  %s2415_s20 = sand.u32 1, %s2235_s14  }
  0x46   : > { %s2783_s22 = scalar_select %p2410_p3, 1, 0 }
  0x47   : > { %s1608_s26 = sshll.u32 %s2239_s15, 10  ;;  %s1541_s21 = sshll.u32 %s2415_s20, 6 }
  0x48   : > { %s2784_s1 = sld [smem:[#allocation22_spill]]  ;;  %s307_s11 = scalar_lea.vmem [#allocation4], %s1541_s21 }
  0x49   : > { %s314_s23 = sshll.u32 %s307_s11, 4  ;;  %p2424_p2 = pnand %p1912_p13, %p49_p0  ;;  %s2428_s23 = int_to_ptr.vmem [resolvable:$true] %s314_s23 }
  0x4b   : > { %p2107_p5 = pneg %p2424_p2 }
  0x4e   : > { %s2422_s10 = scalar_lea.hbm %s2784_s1, %s1608_s26  ;;  %s2110_s25 = scalar_lea.hbm %s2784_s1, 2048 }
  0x4f   : > { %s2105_s3 = scalar_lea.hbm %s2422_s10, 1024  ;;  %p2111_p1 = scmp.lt.s32.totalorder %s2422_s10, %s2784_s1 }
  0x50   : > { %p2106_p11 = scmp.ne.s32.totalorder %s2422_s10, %s2105_s3  ;;  %p2112_p12 = scmp.lt.s32.totalorder %s2110_s25, %s2105_s3 }
  0x52   : > { %p2108_p10 = pnand %p2107_p5, %p2106_p11  ;;  %p2113_p9 = por %p2112_p12, %p2111_p1 }
  0x54   : > { %p2109_p7 = pneg %p2108_p10 }
  0x56   : > { %p2114_p13 = pnand %p2113_p9, %p2109_p7 }
  0x58   : > { %2117 = shalt.err (!%p2114_p13)
}
  0x59   : > { %s2118_s28 = scalar_lea.vmem %s2428_s23, 1024  ;;  %s2249_s26 = smov [#allocation4]  }
  0x5a   : > { %p2119_p0 = scmp.ne.s32.totalorder %s2428_s23, %s2118_s28  ;;  %s2123_s21 = sshll.u32 %s2249_s26, 4  ;;  %s2124_s21 = int_to_ptr.vmem [resolvable:$false] %s2123_s21 }
  0x5b   : > { %s2125_s29 = scalar_lea.vmem %s2124_s21, 2048  ;;  %p2126_p6 = scmp.lt.s32.totalorder %s2428_s23, %s2124_s21 }
  0x5c   : > { %p2121_p11 = pnand %p2119_p0, %p2107_p5  ;;  %p2127_p3 = scmp.lt.s32.totalorder %s2125_s29, %s2118_s28 }
  0x5e   : > { %p2122_p10 = pneg %p2121_p11  ;;  %p2128_p4 = por %p2127_p3, %p2126_p6 }
  0x60   : > { %p2129_p1 = pnand %p2128_p4, %p2122_p10 }
  0x62   : > { %2132 = shalt.err (!%p2129_p1)
}
  0x63   : > { %s2786_s3 = smov 4   ;;  %s2787_s25 = smov 64  }
  0x64   : > { %s2788_s27 = scalar_lea.sflag [#allocation5], %s2415_s20  ;;  %s1544_s11 = sshll.u32 %s2415_s20, 7 }
  0x65   : > { %1901 = dma.hbm_to_vmem [thread:$0]  (!%p2424_p2), %s2422_s10, 1024, %s2428_s23, %s2788_s27, %s2787_s25, %s2787_s25, %s2786_s3  }
  0x66   : > { %s1609_s26 = sshll.u32 %s2239_s15, 11  ;;  %s328_s1 = scalar_lea.vmem [#allocation7], %s1544_s11 }
  0x67   : > { %s2466_s21 = scalar_lea.hbm %s2754_s2, %s1609_s26  ;;  %s335_s5 = sshll.u32 %s328_s1, 4  ;;  %s2468_s5 = int_to_ptr.vmem [resolvable:$true] %s335_s5 }
  0x68   : > { %s2789_s7 = sand.u32 1, %s2239_s15   ;;  %s2133_s14 = scalar_lea.hbm %s2466_s21, 2048 }
  0x69   : > { %s325_s16 = scalar_lea.sflag [#allocation8], %s2789_s7  ;;  %p2134_p4 = scmp.ne.s32.totalorder %s2466_s21, %s2133_s14 }
  0x6a   : > { %s2138_s10 = scalar_lea.hbm %s2754_s2, 4096  ;;  %p2139_p7 = scmp.lt.s32.totalorder %s2466_s21, %s2754_s2 }
  0x6b   : > { %p2136_p6 = pnand %p2134_p4, %p2107_p5  ;;  %p2140_p12 = scmp.lt.s32.totalorder %s2138_s10, %s2133_s14 }
  0x6d   : > { %p2137_p3 = pneg %p2136_p6  ;;  %p2141_p9 = por %p2140_p12, %p2139_p7 }
  0x6f   : > { %p2142_p13 = pnand %p2141_p9, %p2137_p3 }
  0x71   : > { %2145 = shalt.err (!%p2142_p13)
}
  0x72   : > { %s2146_s1 = scalar_lea.vmem %s2468_s5, 2048  ;;  %s2250_s7 = smov [#allocation7]  }
  0x73   : > { %p2147_p0 = scmp.ne.s32.totalorder %s2468_s5, %s2146_s1  ;;  %s2151_s27 = sshll.u32 %s2250_s7, 4  ;;  %s2152_s27 = int_to_ptr.vmem [resolvable:$false] %s2151_s27 }
  0x74   : > { %s2153_s11 = scalar_lea.vmem %s2152_s27, 4096  ;;  %p2154_p1 = scmp.lt.s32.totalorder %s2468_s5, %s2152_s27 }
  0x75   : > { %p2149_p11 = pnand %p2147_p0, %p2107_p5  ;;  %p2155_p4 = scmp.lt.s32.totalorder %s2153_s11, %s2146_s1 }
  0x77   : > { %p2150_p10 = pneg %p2149_p11  ;;  %p2156_p6 = por %p2155_p4, %p2154_p1 }
  0x79   : > { %p2157_p7 = pnand %p2156_p6, %p2150_p10 }
  0x7b   : > { %2160 = shalt.err (!%p2157_p7)
}
  0x7c   : > { %s2790_s14 = smov 8   ;;  %s2791_s26 = smov 128  }
  0x7d   : > { %1904 = dma.hbm_to_vmem [thread:$0]  (!%p2424_p2), %s2466_s21, 2048, %s2468_s5, %s325_s16, %s2791_s26, %s2791_s26, %s2790_s14  }
  0x7e   : > { %347 = sbr.rel (%p2347_p8) target bundleno = 1697 (0x6a1), region = 52  ;;  %s2500_s28 = sand.u32 (!%p2347_p8), 1, %s2231_s13  }
  0x7f   : > { %s1548_s29 = sshll.u32 (!%p2347_p8), %s2500_s28, 6  ;;  %s350_s23 = scalar_lea.sflag (!%p2347_p8), [#allocation5], %s2500_s28 }
  0x80   : > { %s2504_s20 = scalar_lea.vmem (!%p2347_p8), [#allocation4], %s1548_s29  ;;  %p2792_p5 = scmp.ne.s32.totalorder (!%p2347_p8), %s2775_s17, 0 }
  0x83   : > { %2206 = dma.done.wait (%p2792_p5), %s350_s23, 1024  }
  0x84   : > { %2208 = vsyncadd (%p2792_p5), %s350_s23, 4294966272  ;;  %s358_s5 = sand.u32 1, %s2328_s0   ;;  %s1549_s19 = sshll.u32 %s2500_s28, 7 }
  0x85   : > { %s359_s24 = scalar_lea.sflag [#allocation8], %s358_s5  ;;  %s2512_s16 = scalar_lea.vmem [#allocation7], %s1549_s19 }
  0x86   : > { %2210 = dma.done.wait (%p2792_p5), %s359_s24, 2048  }
  0x87   : > { %2212 = vsyncadd (%p2792_p5), %s359_s24, 4294965248  ;;  %p2793_p8 = scmp.eq.s32.totalorder %s2328_s0, 0 }
  0x89   : > { %2214 = dma.done.wait (%p2793_p8), [#allocation8], 2048   ;;  %p2794_p2 = pmov %p2793_p8 }
  0x8b   : > { %2216 = vsyncadd (%p2794_p2), [#allocation8], 4294965248  ;;  %p2795_p3 = pmov %p2794_p2 }
  0x8c   : > { %p2796_p12 = pmov %p2794_p2 }
  0x8d   : > { %2218 = dma.done.wait (%p2795_p3), [#allocation11], 3072  }
  0x8e   : > { %2220 = vsyncadd (%p2796_p12), [#allocation11], 4294964224  ;;  %v1959_v0 = vld [vmem:[#allocation9 + $0x78] sm:$0xff]   ;;  %v1961_v2 = vld [vmem:[#allocation9 + $0x70] sm:$0xff]   ;;  %vm2252_vm0 = vmmov 0   ;;  %s413_s10 = sld [smem:[#allocation3 + %s2328_s0]] }
  0x8f   : > { %v1960_v1 = vld [vmem:[#allocation9 + $0x38] sm:$0xff]   ;;  %1610 = vmatprep.subr.bf16.mxu0 %v1959_v0  ;;  %v1962_v3 = vld [vmem:[#allocation9 + $0x30] sm:$0xff]   ;;  %v1963_v4 = vld [vmem:[#allocation9 + $0x68] sm:$0xff]   ;;  %s1553_s27 = sshll.u32 %s2500_s28, 3  ;;  %s1605_s11 = sshll.u32 %s2328_s0, 7 }
  0x90   : > { %1611 = vmatpush3.bf16.msra.mxu0 %v1960_v1  ;;  %v1964_v5 = vld [vmem:[#allocation9 + $0x28] sm:$0xff]   ;;  %v1965_v6 = vld [vmem:[#allocation9 + $0x60] sm:$0xff]   ;;  %v1967_v8 = vld [vmem:[#allocation9 + $0x58] sm:$0xff]   ;;  %s411_s14 = scalar_lea.vmem [#allocation13], %s1553_s27  ;;  %s1401_s5 = scalar_lea.sflag [#allocation6], %s2500_s28 }
  0x91   : > { %1612 = vmatprep.subr.bf16.mxu0 %v1961_v2  ;;  %v1966_v7 = vld [vmem:[#allocation9 + $0x20] sm:$0xff]   ;;  %v1968_v9 = vld [vmem:[#allocation9 + $0x18] sm:$0xff]   ;;  %v1969_v10 = vld [vmem:[#allocation9 + $0x50] sm:$0xff]   ;;  %s1414_s26 = sshll.u32 %s411_s14, 4  ;;  %p2797_p13 = scmp.ne.s32.totalorder %s2783_s22, 0  ;;  %s1415_s26 = int_to_ptr.vmem [resolvable:$true] %s1414_s26 }
  0x92   : > { %v1977_v11 = vld [vmem:[%s2512_s16 + $0x4] ss:$8 sps:$4 sm:$0xff]   ;;  %v1970_v12 = vld [vmem:[#allocation9 + $0x10] sm:$0xff]   ;;  %v1975_v17 = vld [vmem:[%s2512_s16] ss:$8 sps:$4 sm:$0xff]   ;;  %s2161_s19 = scalar_lea.vmem %s1415_s26, 128 }
  0x93   : > { %686 = vmatprep.mubr.bf16.mxu0 %v1977_v11  ;;  %v1971_v13 = vld [vmem:[#allocation9 + $0x48] sm:$0xff]   ;;  %v1973_v15 = vld [vmem:[#allocation9 + $0x40] sm:$0xff]   ;;  %v1978_v18 = vld [vmem:[%s2512_s16 + $0x14] ss:$8 sps:$4 sm:$0xff]   ;;  %p2162_p9 = scmp.ne.s32.totalorder %s1415_s26, %s2161_s19  ;;  %s2253_s24 = smov [#allocation13]  }
  0x94   : > { %1613 = vmatpush3.bf16.msra.mxu0 %v1962_v3  ;;  %v1972_v14 = vld [vmem:[#allocation9 + $0x8] sm:$0xff]   ;;  %v1974_v16 = vld [vmem:[#allocation9] sm:$0xff]   ;;  %v1980_v19 = vld [vmem:[%s2512_s16 + $0x10] ss:$8 sps:$4 sm:$0xff]  }
  0x95   : > { %1614 = vmatprep.subr.bf16.mxu0 %v1963_v4  ;;  %v1981_v20 = vld [vmem:[%s2512_s16 + $0x24] ss:$8 sps:$4 sm:$0xff]   ;;  %v1983_v21 = vld [vmem:[%s2512_s16 + $0x20] ss:$8 sps:$4 sm:$0xff]   ;;  %v1984_v22 = vld [vmem:[%s2512_s16 + $0x34] ss:$8 sps:$4 sm:$0xff]   ;;  %p2163_p0 = pnand %p2162_p9, %p2797_p13 }
  0x96   : > { %v1986_v23 = vld [vmem:[%s2512_s16 + $0x30] ss:$8 sps:$4 sm:$0xff]   ;;  %v1987_v24 = vld [vmem:[%s2512_s16 + $0x44] ss:$8 sps:$4 sm:$0xff]   ;;  %v1989_v25 = vld [vmem:[%s2512_s16 + $0x40] ss:$8 sps:$4 sm:$0xff]  }
  0x97   : > { %v1990_v26 = vld [vmem:[%s2512_s16 + $0x54] ss:$8 sps:$4 sm:$0xff]   ;;  %v1992_v27 = vld [vmem:[%s2512_s16 + $0x50] ss:$8 sps:$4 sm:$0xff]   ;;  %v1993_v28 = vld [vmem:[%s2512_s16 + $0x64] ss:$8 sps:$4 sm:$0xff]   ;;  %p2164_p11 = pneg %p2163_p0 }
  0x98   : > { %1615 = vmatpush3.bf16.msra.mxu0 %v1964_v5  ;;  %v1995_v29 = vld [vmem:[%s2512_s16 + $0x60] ss:$8 sps:$4 sm:$0xff]   ;;  %v1996_v30 = vld [vmem:[%s2512_s16 + $0x74] ss:$8 sps:$4 sm:$0xff]   ;;  %v1998_v31 = vld [vmem:[%s2512_s16 + $0x70] ss:$8 sps:$4 sm:$0xff]  }
  0x99   : > { %1616 = vmatprep.subr.bf16.mxu0 %v1965_v6  ;;  %v1999_v32 = vld [vmem:[%s2504_s20] sm:$0xff]   ;;  %s2165_s16 = sshll.u32 %s2253_s24, 4  ;;  %s2166_s16 = int_to_ptr.vmem [resolvable:$false] %s2165_s16 }
  0x9a   : > { %1755 = vmatprep.mubr.bf16.mxu1 %v1999_v32  ;;  %s2167_s0 = scalar_lea.vmem %s2166_s16, 256  ;;  %p2168_p10 = scmp.lt.s32.totalorder %s1415_s26, %s2166_s16 }
  0x9b   : > { %p2169_p1 = scmp.lt.s32.totalorder %s2167_s0, %s2161_s19 }
  0x9c   : > { %1617 = vmatpush3.bf16.msra.mxu0 %v1966_v7 }
  0x9d   : > { %1618 = vmatprep.subr.bf16.mxu0 %v1967_v8  ;;  %p2170_p4 = por %p2169_p1, %p2168_p10 }
  0x9f   : > { %p2171_p6 = pnand %p2170_p4, %p2164_p11 }
  0xa0   : > { %1619 = vmatpush3.bf16.msra.mxu0 %v1968_v9 }
  0xa1   : > { %1620 = vmatprep.subr.bf16.mxu0 %v1969_v10 }
  0xa4   : > { %1621 = vmatpush3.bf16.msra.mxu0 %v1970_v12 }
  0xa5   : > { %1622 = vmatprep.subr.bf16.mxu0 %v1971_v13 }
  0xa8   : > { %1623 = vmatpush3.bf16.msra.mxu0 %v1972_v14 }
  0xa9   : > { %1624 = vmatprep.subr.bf16.mxu0 %v1973_v15 }
  0xac   : > { %1625 = vmatpush3.bf16.msra.mxu0 %v1974_v16 }
  0xaf   : > { %687 = vmatmul.mubr.bf16.vlgmr.msra.gmra.mxu0 %v1975_v17 }
  0xb0   : > { %694 = vmatprep.mubr.bf16.mxu0 %v1978_v18 }
  0xb7   : > { %695 = vmatmul.mubr.bf16.gmra.mxu0 %v1980_v19 }
  0xb8   : > { %702 = vmatprep.mubr.bf16.mxu0 %v1981_v20 }
  0xbf   : > { %703 = vmatmul.mubr.bf16.gmra.mxu0 %v1983_v21 }
  0xc0   : > { %710 = vmatprep.mubr.bf16.mxu0 %v1984_v22 }
  0xc7   : > { %711 = vmatmul.mubr.bf16.gmra.mxu0 %v1986_v23 }
  0xc8   : > { %718 = vmatprep.mubr.bf16.mxu0 %v1987_v24 }
  0xcf   : > { %719 = vmatmul.mubr.bf16.gmra.mxu0 %v1989_v25  ;;  %v2007_v25 = vld [vmem:[#allocation10 + $0x38] sm:$0xff]  }
  0xd0   : > { %726 = vmatprep.mubr.bf16.mxu0 %v1990_v26  ;;  %v2547_v26 = vld [vmem:[%s2504_s20 + $0x8] sm:$0xff]  }
  0xd7   : > { %727 = vmatmul.mubr.bf16.gmra.mxu0 %v1992_v27  ;;  %v2551_v27 = vld [vmem:[%s2504_s20 + $0x10] sm:$0xff]  }
  0xd8   : > { %734 = vmatprep.mubr.bf16.mxu0 %v1993_v28  ;;  %v2008_v28 = vld [vmem:[#allocation10 + $0x30] sm:$0xff]  }
  0xdf   : > { %735 = vmatmul.mubr.bf16.gmra.mxu0 %v1995_v29  ;;  %v2009_v29 = vld [vmem:[#allocation10 + $0x28] sm:$0xff]  }
  0xe0   : > { %742 = vmatprep.mubr.bf16.mxu0 %v1996_v30  ;;  %v2556_v30 = vld [vmem:[%s2504_s20 + $0x18] sm:$0xff]  }
  0xe7   : > { %743 = vmatmul.mubr.bf16.gmra.mxu0 %v1998_v31  ;;  %v2559_v31 = vld [vmem:[%s2504_s20 + $0x20] sm:$0xff]  }
  0xe8   : > { %1819 = vmatprep.mubr.bf16.mxu0 %v1999_v32  ;;  %v2010_v32 = vld [vmem:[#allocation10 + $0x20] sm:$0xff]  }
 0x16f   : > { %v1626_v33 = vpop.f32.mrf.mxu0 }
 0x171   : > { %v1627_v34 = vpop.f32.mrf.mxu0 }
 0x172   : > { %v1628_v35 = vadd.f32 %v1627_v34, %v1626_v33  ;;  %v2011_v33 = vld [vmem:[#allocation10 + $0x18] sm:$0xff]   ;;  %v2564_v34 = vld [vmem:[%s2504_s20 + $0x28] sm:$0xff]  }
 0x173   : > { %v1629_v36 = vpop.f32.mrf.mxu0 }
 0x175   : > { %v1630_v37 = vpop.f32.mrf.mxu0 }
 0x176   : > { %v1631_v38 = vadd.f32 %v1630_v37, %v1629_v36  ;;  %v2572_v36 = vld [vmem:[%s2504_s20 + $0x38] sm:$0xff]   ;;  %v2012_v37 = vld [vmem:[#allocation10 + $0x10] sm:$0xff]  }
 0x177   : > { %v1632_v39 = vpop.f32.mrf.mxu0 }
 0x178   : > { %v2543_v40 = vpack.c.bf16 %v1631_v38, %v1628_v35  ;;  %v2567_v35 = vld [vmem:[%s2504_s20 + $0x30] sm:$0xff]   ;;  %v2013_v38 = vld [vmem:[#allocation10 + $0x8] sm:$0xff]   ;;  %s1412_s20 = scalar_lea.hbm %s2761_s9, %s1605_s11 }
 0x179   : > { %v1633_v41 = vpop.f32.mrf.mxu0 }
 0x17a   : > { %v1634_v42 = vadd.f32 %v1633_v41, %v1632_v39  ;;  %v2014_v39 = vld [vmem:[#allocation10] sm:$0xff]  }
 0x17b   : > { %v1635_v43 = vpop.f32.mrf.mxu0 }
 0x17d   : > { %v1636_v44 = vpop.f32.mrf.mxu0 }
 0x17e   : > { %v1637_v45 = vadd.f32 %v1636_v44, %v1635_v43 }
 0x17f   : > { %v1638_v46 = vpop.f32.mrf.mxu0 }
 0x180   : > { %v752_v47 = vpack.c.bf16 %v1637_v45, %v1634_v42  ;;  %v1586_v42 = vld [vmem:[%s2756_s4] ss:$0 sm:$0xff] }
 0x181   : > { %v1639_v48 = vpop.f32.mrf.mxu0 }
 0x182   : > { %v1640_v23 = vadd.f32 %v1639_v48, %v1638_v46 }
 0x183   : > { %v1641_v49 = vpop.f32.mrf.mxu0 }
 0x185   : > { %v1642_v50 = vpop.f32.mrf.mxu0 }
 0x186   : > { %v1643_v21 = vadd.f32 %v1642_v50, %v1641_v49 }
 0x187   : > { %v1644_v51 = vpop.f32.mrf.mxu0 }
 0x188   : > { %v753_v24 = vpack.c.bf16 %v1643_v21, %v1640_v23 }
 0x189   : > { %v1645_v52 = vpop.f32.mrf.mxu0 }
 0x18a   : > { %v1646_v20 = vadd.f32 %v1645_v52, %v1644_v51 }
 0x18b   : > { %v1647_v53 = vpop.f32.mrf.mxu0 }
 0x18d   : > { %v1648_v54 = vpop.f32.mrf.mxu0 }
 0x18e   : > { %v1649_v18 = vadd.f32 %v1648_v54, %v1647_v53 }
 0x18f   : > { %v1650_v55 = vpop.f32.mrf.mxu0 }
 0x190   : > { %v754_v22 = vpack.c.bf16 %v1649_v18, %v1646_v20 }
 0x191   : > { %v1651_v56 = vpop.f32.mrf.mxu0 }
 0x192   : > { %v1652_v17 = vadd.f32 %v1651_v56, %v1650_v55 }
 0x193   : > { %v1653_v57 = vpop.f32.mrf.mxu0 }
 0x195   : > { %v1654_v58 = vpop.f32.mrf.mxu0 }
 0x196   : > { %v1655_v15 = vadd.f32 %v1654_v58, %v1653_v57 }
 0x197   : > { %v1656_v59 = vpop.f32.mrf.mxu0 }
 0x198   : > { %v755_v19 = vpack.c.bf16 %v1655_v15, %v1652_v17 }
 0x199   : > { %v1657_v60 = vpop.f32.mrf.mxu0 }
 0x19a   : > { %v1658_v14 = vadd.f32 %v1657_v60, %v1656_v59 }
 0x19b   : > { %v1659_v61 = vpop.f32.mrf.mxu0 }
 0x19d   : > { %v1660_v62 = vpop.f32.mrf.mxu0 }
 0x19e   : > { %v1661_v12 = vadd.f32 %v1660_v62, %v1659_v61 }
 0x19f   : > { %v1662_v63 = vpop.f32.mrf.mxu0 }
 0x1a0   : > { %v756_v16 = vpack.c.bf16 %v1661_v12, %v1658_v14 }
 0x1a1   : > { %v1663_v0 = vpop.f32.mrf.mxu0 }
 0x1a2   : > { %v1664_v10 = vadd.f32 %v1663_v0, %v1662_v63 }
 0x1a3   : > { %v1665_v1 = vpop.f32.mrf.mxu0 }
 0x1a5   : > { %v1666_v2 = vpop.f32.mrf.mxu0 }
 0x1a6   : > { %v1667_v7 = vadd.f32 %v1666_v2, %v1665_v1 }
 0x1a7   : > { %v1668_v3 = vpop.f32.mrf.mxu0 }
 0x1a8   : > { %v757_v13 = vpack.c.bf16 %v1667_v7, %v1664_v10 }
 0x1a9   : > { %v1669_v4 = vpop.f32.mrf.mxu0 }
 0x1aa   : > { %v1670_v8 = vadd.f32 %v1669_v4, %v1668_v3 }
 0x1ab   : > { %v1671_v5 = vpop.f32.mrf.mxu0 }
 0x1ad   : > { %v1672_v6 = vpop.f32.mrf.mxu0 }
 0x1ae   : > { %v1673_v9 = vadd.f32 %v1672_v6, %v1671_v5 }
 0x1b0   : > { %v758_v11 = vpack.c.bf16 %v1673_v9, %v1670_v8 }
 0x1b2   : > { %1739 = vmatprep.subr.bf16.mxu1 %v758_v11 }
 0x1b3   : > { %1740 = vmatpush3.bf16.msra.mxu1 %v758_v11 }
 0x1b4   : > { %1741 = vmatprep.subr.bf16.mxu1 %v757_v13 }
 0x1b7   : > { %1742 = vmatpush3.bf16.msra.mxu1 %v757_v13 }
 0x1b8   : > { %1743 = vmatprep.subr.bf16.mxu1 %v756_v16 }
 0x1bb   : > { %1744 = vmatpush3.bf16.msra.mxu1 %v756_v16 }
 0x1bc   : > { %1745 = vmatprep.subr.bf16.mxu1 %v755_v19 }
 0x1bf   : > { %1746 = vmatpush3.bf16.msra.mxu1 %v755_v19 }
 0x1c0   : > { %1747 = vmatprep.subr.bf16.mxu1 %v754_v22 }
 0x1c3   : > { %1748 = vmatpush3.bf16.msra.mxu1 %v754_v22 }
 0x1c4   : > { %1749 = vmatprep.subr.bf16.mxu1 %v753_v24 }
 0x1c7   : > { %1750 = vmatpush3.bf16.msra.mxu1 %v753_v24 }
 0x1c8   : > { %1751 = vmatprep.subr.bf16.mxu1 %v752_v47 }
 0x1cb   : > { %1752 = vmatpush3.bf16.msra.mxu1 %v752_v47 }
 0x1cc   : > { %1753 = vmatprep.subr.bf16.mxu1 %v2543_v40 }
 0x1cf   : > { %1754 = vmatpush3.bf16.msra.mxu1 %v2543_v40 }
 0x1d0   : > { %1771 = vmatprep.subr.bf16.mxu1 %v2007_v25 }
 0x1d2   : > { %1756 = vmatmul.mubr.bf16.vlgmr.msra.gmra.mxu1 %v2547_v26 }
 0x1d3   : > { %1759 = vmatprep.mubr.bf16.mxu1 %v2551_v27  ;;  %1772 = vmatpush3.bf16.msra.mxu1 %v2007_v25 }
 0x1d4   : > { %1773 = vmatprep.subr.bf16.mxu1 %v2008_v28 }
 0x1d7   : > { %1774 = vmatpush3.bf16.msra.mxu1 %v2008_v28 }
 0x1d8   : > { %1775 = vmatprep.subr.bf16.mxu1 %v2009_v29 }
 0x1da   : > { %1760 = vmatmul.mubr.bf16.gmra.mxu1 %v2556_v30 }
 0x1db   : > { %1763 = vmatprep.mubr.bf16.mxu1 %v2559_v31  ;;  %1776 = vmatpush3.bf16.msra.mxu1 %v2009_v29 }
 0x1dc   : > { %1777 = vmatprep.subr.bf16.mxu1 %v2010_v32 }
 0x1df   : > { %1778 = vmatpush3.bf16.msra.mxu1 %v2010_v32 }
 0x1e0   : > { %1779 = vmatprep.subr.bf16.mxu1 %v2011_v33 }
 0x1e2   : > { %1764 = vmatmul.mubr.bf16.gmra.mxu1 %v2564_v34 }
 0x1e3   : > { %1767 = vmatprep.mubr.bf16.mxu1 %v2567_v35  ;;  %1780 = vmatpush3.bf16.msra.mxu1 %v2011_v33 }
 0x1e4   : > { %1781 = vmatprep.subr.bf16.mxu1 %v2012_v37 }
 0x1e7   : > { %1782 = vmatpush3.bf16.msra.mxu1 %v2012_v37 }
 0x1e8   : > { %1783 = vmatprep.subr.bf16.mxu1 %v2013_v38 }
 0x1ea   : > { %1768 = vmatmul.mubr.bf16.gmra.mxu1 %v2572_v36 }
 0x1eb   : > { %1784 = vmatpush3.bf16.msra.mxu1 %v2013_v38 }
 0x1ec   : > { %1785 = vmatprep.subr.bf16.mxu1 %v2014_v39 }
 0x1ef   : > { %1786 = vmatpush3.bf16.msra.mxu1 %v2014_v39 }
 0x292   : > { %v1757_v40 = vpop.f32.mrf.mxu1 }
 0x293   : > { %v857_v46 = vadd.f32 %v1757_v40, %v1586_v42 }
 0x294   : > { %v848_v41 = vpop.f32.mrf.mxu1 }
 0x295   : > { %v849_v44 = vadd.f32 %v1586_v42, %v848_v41  ;;  %v913_v53 = vmax.f32 %v857_v46, 0.0 }
 0x296   : > { %v1758_v43 = vpop.f32.mrf.mxu1 }
 0x297   : > { %v860_v45 = vadd.f32 %v1758_v43, %v1586_v42  ;;  %v911_v51 = vmax.f32 %v849_v44, 0.0 }
 0x298   : > { %v851_v47 = vpop.f32.mrf.mxu1 }
 0x299   : > { %v852_v48 = vadd.f32 %v1586_v42, %v851_v47  ;;  %v914_v49 = vmax.f32 %v860_v45, 0.0 }
 0x29a   : > { %v1761_v50 = vpop.f32.mrf.mxu1 }
 0x29b   : > { %v912_v52 = vmax.f32 %v852_v48, 0.0  ;;  %v928_v56 = vpack.c.bf16 %v914_v49, %v913_v53  ;;  %v873_v60 = vadd.f32 %v1761_v50, %v1586_v42 }
 0x29c   : > { %v864_v54 = vpop.f32.mrf.mxu1 }
 0x29d   : > { %v927_v55 = vpack.c.bf16 %v912_v52, %v911_v51  ;;  %v865_v58 = vadd.f32 %v1586_v42, %v864_v54  ;;  %v917_v3 = vmax.f32 %v873_v60, 0.0 }
 0x29e   : > { %v1762_v57 = vpop.f32.mrf.mxu1 }
 0x29f   : > { %v876_v59 = vadd.f32 %v1762_v57, %v1586_v42  ;;  %1787 = vmatprep.mubr.bf16.mxu1 %v927_v55  ;;  %v915_v1 = vmax.f32 %v865_v58, 0.0 }
 0x2a0   : > { %v867_v61 = vpop.f32.mrf.mxu1  ;;  %1788 = vmatmul.mubr.bf16.vlgmr.msra.gmra.mxu1 %v928_v56 }
 0x2a1   : > { %v868_v62 = vadd.f32 %v1586_v42, %v867_v61  ;;  %v918_v63 = vmax.f32 %v876_v59, 0.0 }
 0x2a2   : > { %v1765_v0 = vpop.f32.mrf.mxu1 }
 0x2a3   : > { %v916_v2 = vmax.f32 %v868_v62, 0.0  ;;  %v930_v6 = vpack.c.bf16 %v918_v63, %v917_v3  ;;  %v889_v10 = vadd.f32 %v1765_v0, %v1586_v42  ;;  %v2251_v0 = vmov 0.0   ;;  %v1301_v3 = vld [vmem:[#allocation12 + $0x30] sm:$0xff] }
 0x2a4   : > { %v880_v4 = vpop.f32.mrf.mxu1  ;;  %1835 = vmatprep.subr.mxu1 %v2251_v0 }
 0x2a5   : > { %v929_v5 = vpack.c.bf16 %v916_v2, %v915_v1  ;;  %v881_v8 = vadd.f32 %v1586_v42, %v880_v4  ;;  %v921_v17 = vmax.f32 %v889_v10, 0.0  ;;  %v1310_v1 = vld [vmem:[#allocation12 + $0x78] sm:$0xff]  ;;  %v1309_v2 = vld [vmem:[#allocation12 + $0x70] sm:$0xff]  ;;  %v1300_v4 = vld [vmem:[#allocation12 + $0x28] sm:$0xff] }
 0x2a6   : > { %v1766_v7 = vpop.f32.mrf.mxu1  ;;  %1836 = vmatpush3.msra.mxu1 %v1310_v1 }
 0x2a7   : > { %v892_v9 = vadd.f32 %v1766_v7, %v1586_v42  ;;  %1791 = vmatprep.mubr.bf16.mxu1 %v929_v5  ;;  %v919_v15 = vmax.f32 %v881_v8, 0.0  ;;  %1837 = vmatprep.subr.mxu1 %v2251_v0  ;;  %v1299_v5 = vld [vmem:[#allocation12 + $0x20] sm:$0xff]  ;;  %v1297_v7 = vld [vmem:[#allocation12 + $0x10] sm:$0xff]  ;;  %v1296_v8 = vld [vmem:[#allocation12 + $0x8] sm:$0xff] }
 0x2a8   : > { %v883_v11 = vpop.f32.mrf.mxu1  ;;  %1792 = vmatmul.mubr.bf16.gmra.mxu1 %v930_v6  ;;  %v1298_v6 = vld [vmem:[#allocation12 + $0x18] sm:$0xff] }
 0x2a9   : > { %v884_v12 = vadd.f32 %v1586_v42, %v883_v11  ;;  %v922_v13 = vmax.f32 %v892_v9, 0.0  ;;  %1838 = vmatpush3.msra.mxu1 %v1309_v2  ;;  %v1295_v9 = vld [vmem:[#allocation12] sm:$0xff] }
 0x2aa   : > { %v1769_v14 = vpop.f32.mrf.mxu1  ;;  %1839 = vmatprep.subr.mxu1 %v2251_v0 }
 0x2ab   : > { %v920_v16 = vmax.f32 %v884_v12, 0.0  ;;  %v932_v20 = vpack.c.bf16 %v922_v13, %v921_v17  ;;  %v905_v24 = vadd.f32 %v1769_v14, %v1586_v42  ;;  %v1224_v12 = vlaneseq }
 0x2ac   : > { %v896_v18 = vpop.f32.mrf.mxu1 }
 0x2ad   : > { %v931_v19 = vpack.c.bf16 %v920_v16, %v919_v15  ;;  %v897_v22 = vadd.f32 %v1586_v42, %v896_v18  ;;  %v925_v37 = vmax.f32 %v905_v24, 0.0  ;;  %v2586_v15 = vshrl.u32 %v1224_v12, 7  ;;  %v2601_v24 = vld [vmem:[%s2758_s6] ss:$0 sm:$0xff] }
 0x2ae   : > { %v1770_v21 = vpop.f32.mrf.mxu1 }
 0x2af   : > { %v908_v23 = vadd.f32 %v1770_v21, %v1586_v42  ;;  %1795 = vmatprep.mubr.bf16.mxu1 %v931_v19  ;;  %v923_v32 = vmax.f32 %v897_v22, 0.0  ;;  %v1227_v18 = vadd.s32 16, %v2586_v15  ;;  %v2592_v21 = vadd.s32 24, %v2586_v15 }
 0x2b0   : > { %v899_v25 = vpop.f32.mrf.mxu1  ;;  %1796 = vmatmul.mubr.bf16.gmra.mxu1 %v932_v20  ;;  %v2589_v20 = vstv %s413_s10  ;;  %v1231_v22 = vadd.s32 48, %v2586_v15  ;;  %v1238_v2 = vadd.s32 104, %v2586_v15 }
 0x2b1   : > { %v900_v28 = vadd.f32 %v1586_v42, %v899_v25  ;;  %v926_v29 = vmax.f32 %v908_v23, 0.0  ;;  %v2596_v23 = vadd.s32 32, %v2586_v15  ;;  %v1232_v25 = vadd.s32 56, %v2586_v15 }
 0x2b2   : > { %vm1244_vm1 = vcmp.lt.s32.totalorder %v1227_v18, %v2589_v20  ;;  %vm1242_vm2 = vcmp.lt.s32.totalorder %v2586_v15, %v2589_v20  ;;  %vm1245_vm3 = vcmp.lt.s32.totalorder %v2592_v21, %v2589_v20  ;;  %vm1248_vm4 = vcmp.lt.s32.totalorder %v1231_v22, %v2589_v20 }
 0x2b3   : > { %v924_v33 = vmax.f32 %v900_v28, 0.0  ;;  %v934_v39 = vpack.c.bf16 %v926_v29, %v925_v37  ;;  %v2605_v29 = vadd.s32 40, %v2586_v15  ;;  %v2614_v37 = vadd.s32 88, %v2586_v15 }
 0x2b4   : > { %vm1246_vm5 = vcmp.lt.s32.totalorder %v2596_v23, %v2589_v20  ;;  %vm1249_vm6 = vcmp.lt.s32.totalorder %v1232_v25, %v2589_v20 }
 0x2b5   : > { %v933_v38 = vpack.c.bf16 %v924_v33, %v923_v32  ;;  %v2608_v32 = vadd.s32 8, %v2586_v15  ;;  %v2611_v33 = vadd.s32 80, %v2586_v15  ;;  %vm1247_vm7 = vcmp.lt.s32.totalorder %v2605_v29, %v2589_v20 }
 0x2b6   : > { %vm1253_vm10 = vcmp.lt.s32.totalorder %v2614_v37, %v2589_v20 }
 0x2b7   : > { %1799 = vmatprep.mubr.bf16.mxu1 %v933_v38  ;;  %vm1243_vm8 = vcmp.lt.s32.totalorder %v2608_v32, %v2589_v20  ;;  %vm1252_vm9 = vcmp.lt.s32.totalorder %v2611_v33, %v2589_v20 }
 0x2b8   : > { %1800 = vmatmul.mubr.bf16.gmra.mxu1 %v934_v39  ;;  %v2620_v39 = vadd.s32 64, %v2586_v15 }
 0x2b9   : > { %1867 = vmatprep.mubr.msk.f32.mxu1 %vm2252_vm0, %v2251_v0  ;;  %vm1255_vm0 = vcmp.lt.s32.totalorder %v1238_v2, %v2589_v20 }
 0x2ba   : > { %vm1250_vm11 = vcmp.lt.s32.totalorder %v2620_v39, %v2589_v20 }
 0x360   : > { %v1789_v40 = vpop.f32.mrf.mxu1 }
 0x362   : > { %v1033_v41 = vpop.f32.mrf.mxu1 }
 0x364   : > { %v1790_v43 = vpop.f32.mrf.mxu1 }
 0x365   : > { %v1097_v62 = vpack.c.bf16 %v1790_v43, %v1789_v40  ;;  %v2623_v40 = vadd.s32 72, %v2586_v15  ;;  %v2632_v43 = vadd.s32 112, %v2586_v15 }
 0x366   : > { %v1036_v44 = vpop.f32.mrf.mxu1 }
 0x367   : > { %v1096_v63 = vpack.c.bf16 %v1036_v44, %v1033_v41  ;;  %vm1251_vm12 = vcmp.lt.s32.totalorder %v2623_v40, %v2589_v20  ;;  %vm1256_vm13 = vcmp.lt.s32.totalorder %v2632_v43, %v2589_v20 }
 0x368   : > { %v1793_v45 = vpop.f32.mrf.mxu1 }
 0x36a   : > { %v1049_v46 = vpop.f32.mrf.mxu1 }
 0x36c   : > { %v1794_v47 = vpop.f32.mrf.mxu1 }
 0x36d   : > { %v1099_v60 = vpack.c.bf16 %v1794_v47, %v1793_v45 }
 0x36e   : > { %v1052_v48 = vpop.f32.mrf.mxu1 }
 0x36f   : > { %v1098_v61 = vpack.c.bf16 %v1052_v48, %v1049_v46  ;;  %v1237_v48 = vadd.s32 96, %v2586_v15 }
 0x370   : > { %v1797_v49 = vpop.f32.mrf.mxu1 }
 0x371   : > { %vm1254_vm14 = vcmp.lt.s32.totalorder %v1237_v48, %v2589_v20 }
 0x372   : > { %v1065_v50 = vpop.f32.mrf.mxu1 }
 0x374   : > { %v1798_v51 = vpop.f32.mrf.mxu1 }
 0x375   : > { %v1101_v58 = vpack.c.bf16 %v1798_v51, %v1797_v49 }
 0x376   : > { %v1068_v42 = vpop.f32.mrf.mxu1 }
 0x377   : > { %v1100_v59 = vpack.c.bf16 %v1068_v42, %v1065_v50  ;;  %v1240_v42 = vadd.s32 120, %v2586_v15 }
 0x378   : > { %v1801_v52 = vpop.f32.mrf.mxu1 }
 0x379   : > { %vm1257_vm15 = vcmp.lt.s32.totalorder %v1240_v42, %v2589_v20 }
 0x37a   : > { %v1081_v53 = vpop.f32.mrf.mxu1 }
 0x37c   : > { %v1802_v54 = vpop.f32.mrf.mxu1 }
 0x37d   : > { %v1103_v55 = vpack.c.bf16 %v1802_v54, %v1801_v52 }
 0x37e   : > { %v1084_v56 = vpop.f32.mrf.mxu1 }
 0x37f   : > { %v1102_v57 = vpack.c.bf16 %v1084_v56, %v1081_v53  ;;  %1803 = vmatprep.subr.bf16.mxu0 %v1103_v55 }
 0x380   : > { %1804 = vmatpush3.bf16.msra.mxu0 %v1103_v55 }
 0x381   : > { %1805 = vmatprep.subr.bf16.mxu0 %v1102_v57 }
 0x384   : > { %1806 = vmatpush3.bf16.msra.mxu0 %v1102_v57 }
 0x385   : > { %1807 = vmatprep.subr.bf16.mxu0 %v1101_v58 }
 0x388   : > { %1808 = vmatpush3.bf16.msra.mxu0 %v1101_v58 }
 0x389   : > { %1809 = vmatprep.subr.bf16.mxu0 %v1100_v59 }
 0x38c   : > { %1810 = vmatpush3.bf16.msra.mxu0 %v1100_v59 }
 0x38d   : > { %1811 = vmatprep.subr.bf16.mxu0 %v1099_v60 }
 0x390   : > { %1812 = vmatpush3.bf16.msra.mxu0 %v1099_v60 }
 0x391   : > { %1813 = vmatprep.subr.bf16.mxu0 %v1098_v61 }
 0x394   : > { %1814 = vmatpush3.bf16.msra.mxu0 %v1098_v61 }
 0x395   : > { %1815 = vmatprep.subr.bf16.mxu0 %v1097_v62 }
 0x398   : > { %1816 = vmatpush3.bf16.msra.mxu0 %v1097_v62 }
 0x399   : > { %1817 = vmatprep.subr.bf16.mxu0 %v1096_v63 }
 0x39c   : > { %1818 = vmatpush3.bf16.msra.mxu0 %v1096_v63 }
 0x39f   : > { %1820 = vmatmul.mubr.bf16.vlgmr.msra.gmra.mxu0 %v2547_v26  ;;  %v1308_v26 = vld [vmem:[#allocation12 + $0x68] sm:$0xff] }
 0x3a0   : > { %1823 = vmatprep.mubr.bf16.mxu0 %v2551_v27  ;;  %1840 = vmatpush3.msra.mxu1 %v1308_v26  ;;  %v1307_v27 = vld [vmem:[#allocation12 + $0x60] sm:$0xff] }
 0x3a1   : > { %1841 = vmatprep.subr.mxu1 %v2251_v0 }
 0x3a2   : > { %1842 = vmatpush3.msra.mxu1 %v1307_v27 }
 0x3a3   : > { %1843 = vmatprep.subr.mxu1 %v2251_v0 }
 0x3a7   : > { %1824 = vmatmul.mubr.bf16.gmra.mxu0 %v2556_v30  ;;  %v1306_v30 = vld [vmem:[#allocation12 + $0x58] sm:$0xff] }
 0x3a8   : > { %1827 = vmatprep.mubr.bf16.mxu0 %v2559_v31  ;;  %1844 = vmatpush3.msra.mxu1 %v1306_v30  ;;  %v1305_v31 = vld [vmem:[#allocation12 + $0x50] sm:$0xff] }
 0x3a9   : > { %1845 = vmatprep.subr.mxu1 %v2251_v0 }
 0x3aa   : > { %1846 = vmatpush3.msra.mxu1 %v1305_v31 }
 0x3ab   : > { %1847 = vmatprep.subr.mxu1 %v2251_v0 }
 0x3af   : > { %1828 = vmatmul.mubr.bf16.gmra.mxu0 %v2564_v34  ;;  %v1304_v34 = vld [vmem:[#allocation12 + $0x48] sm:$0xff] }
 0x3b0   : > { %1831 = vmatprep.mubr.bf16.mxu0 %v2567_v35  ;;  %1848 = vmatpush3.msra.mxu1 %v1304_v34  ;;  %v1303_v35 = vld [vmem:[#allocation12 + $0x40] sm:$0xff] }
 0x3b1   : > { %1849 = vmatprep.subr.mxu1 %v2251_v0 }
 0x3b2   : > { %1850 = vmatpush3.msra.mxu1 %v1303_v35 }
 0x3b3   : > { %1851 = vmatprep.subr.mxu1 %v2251_v0 }
 0x3b7   : > { %1832 = vmatmul.mubr.bf16.gmra.mxu0 %v2572_v36  ;;  %v1302_v36 = vld [vmem:[#allocation12 + $0x38] sm:$0xff] }
 0x3b8   : > { %1852 = vmatpush3.msra.mxu1 %v1302_v36 }
 0x3b9   : > { %1853 = vmatprep.subr.mxu1 %v2251_v0 }
 0x3ba   : > { %1854 = vmatpush3.msra.mxu1 %v1301_v3 }
 0x3bb   : > { %1855 = vmatprep.subr.mxu1 %v2251_v0 }
 0x3bc   : > { %1856 = vmatpush3.msra.mxu1 %v1300_v4 }
 0x3bd   : > { %1857 = vmatprep.subr.mxu1 %v2251_v0 }
 0x3be   : > { %1858 = vmatpush3.msra.mxu1 %v1299_v5 }
 0x3bf   : > { %1859 = vmatprep.subr.mxu1 %v2251_v0 }
 0x3c0   : > { %1860 = vmatpush3.msra.mxu1 %v1298_v6 }
 0x3c1   : > { %1861 = vmatprep.subr.mxu1 %v2251_v0 }
 0x3c2   : > { %1862 = vmatpush3.msra.mxu1 %v1297_v7 }
 0x3c3   : > { %1863 = vmatprep.subr.mxu1 %v2251_v0 }
 0x3c4   : > { %1864 = vmatpush3.msra.mxu1 %v1296_v8 }
 0x3c5   : > { %1865 = vmatprep.subr.mxu1 %v2251_v0 }
 0x3c6   : > { %1866 = vmatpush3.msra.mxu1 %v1295_v9 }
 0x45f   : > { %v1821_v10 = vpop.f32.mrf.mxu0 }
 0x460   : > { %v1154_v41 = vadd.f32 %v1821_v10, %v2601_v24 }
 0x461   : > { %v1145_v11 = vpop.f32.mrf.mxu0 }
 0x462   : > { %v1146_v44 = vadd.f32 %v2601_v24, %v1145_v11  ;;  %v1210_v52 = vmax.f32 %v1154_v41, 0.0 }
 0x463   : > { %v1822_v13 = vpop.f32.mrf.mxu0 }
 0x464   : > { %v1157_v49 = vadd.f32 %v1822_v13, %v2601_v24  ;;  %v1208_v55 = vmax.f32 %v1146_v44, 0.0  ;;  %v1260_v26 = vsel %vm1244_vm1, %v1210_v52, -1e+30  ;;  %vm1382_vm1 = vcmask 1040384  }
 0x465   : > { %v1148_v14 = vpop.f32.mrf.mxu0 }
 0x466   : > { %v1149_v56 = vadd.f32 %v2601_v24, %v1148_v14  ;;  %v1211_v63 = vmax.f32 %v1157_v49, 0.0  ;;  %v1258_v34 = vsel %vm1242_vm2, %v1208_v55, -1e+30 }
 0x467   : > { %v1825_v16 = vpop.f32.mrf.mxu0 }
 0x468   : > { %v1170_v45 = vadd.f32 %v1825_v16, %v2601_v24  ;;  %v1209_v35 = vmax.f32 %v1149_v56, 0.0  ;;  %v1261_v9 = vsel %vm1245_vm3, %v1211_v63, -1e+30 }
 0x469   : > { %v1161_v17 = vpop.f32.mrf.mxu0 }
 0x46a   : > { %v1162_v50 = vadd.f32 %v2601_v24, %v1161_v17  ;;  %v1214_v57 = vmax.f32 %v1170_v45, 0.0  ;;  %v1259_v18 = vsel %vm1243_vm8, %v1209_v35, -1e+30 }
 0x46b   : > { %v1826_v19 = vpop.f32.mrf.mxu0 }
 0x46c   : > { %v1173_v47 = vadd.f32 %v1826_v19, %v2601_v24  ;;  %v1212_v0 = vmax.f32 %v1162_v50, 0.0  ;;  %v1264_v36 = vsel %vm1248_vm4, %v1214_v57, -1e+30 }
 0x46d   : > { %v1164_v28 = vpop.f32.mrf.mxu0  ;;  %v1276_v19 = vmax.f32 %v1260_v26, %v1264_v36 }
 0x46e   : > { %v1165_v53 = vadd.f32 %v2601_v24, %v1164_v28  ;;  %v1215_v60 = vmax.f32 %v1173_v47, 0.0  ;;  %v1262_v10 = vsel %vm1246_vm5, %v1212_v0, -1e+30 }
 0x46f   : > { %v1829_v38 = vpop.f32.mrf.mxu0  ;;  %v1274_v32 = vmax.f32 %v1258_v34, %v1262_v10 }
 0x470   : > { %v1186_v58 = vadd.f32 %v1829_v38, %v2601_v24  ;;  %v1213_v27 = vmax.f32 %v1165_v53, 0.0  ;;  %v1265_v5 = vsel %vm1249_vm6, %v1215_v60, -1e+30 }
 0x471   : > { %v1177_v46 = vpop.f32.mrf.mxu0  ;;  %v1277_v21 = vmax.f32 %v1261_v9, %v1265_v5 }
 0x472   : > { %v1178_v61 = vadd.f32 %v2601_v24, %v1177_v46  ;;  %v1218_v3 = vmax.f32 %v1186_v58, 0.0  ;;  %v1263_v13 = vsel %vm1247_vm7, %v1213_v27, -1e+30 }
 0x473   : > { %v1830_v51 = vpop.f32.mrf.mxu0  ;;  %v1275_v38 = vmax.f32 %v1259_v18, %v1263_v13 }
 0x474   : > { %v1189_v54 = vadd.f32 %v1830_v51, %v2601_v24  ;;  %v1216_v6 = vmax.f32 %v1178_v61, 0.0  ;;  %v1268_v22 = vsel %vm1252_vm9, %v1218_v3, -1e+30 }
 0x475   : > { %v1180_v59 = vpop.f32.mrf.mxu0  ;;  %v1280_v46 = vmax.f32 %v1276_v19, %v1268_v22 }
 0x476   : > { %v1181_v62 = vadd.f32 %v2601_v24, %v1180_v59  ;;  %v1219_v30 = vmax.f32 %v1189_v54, 0.0  ;;  %v1266_v25 = vsel %vm1250_vm11, %v1216_v6, -1e+30  ;;  %v1311_v59 = vld [vmem:[%s2760_s8] sm:$0x1] }
 0x477   : > { %v1833_v1 = vpop.f32.mrf.mxu0  ;;  %v1278_v40 = vmax.f32 %v1274_v32, %v1266_v25 }
 0x478   : > { %v1202_v31 = vadd.f32 %v1833_v1, %v2601_v24  ;;  %v1217_v7 = vmax.f32 %v1181_v62, 0.0  ;;  %v1269_v14 = vsel %vm1253_vm10, %v1219_v30, -1e+30 }
 0x479   : > { %v1193_v4 = vpop.f32.mrf.mxu0  ;;  %v1281_v41 = vmax.f32 %v1277_v21, %v1269_v14 }
 0x47a   : > { %v1194_v8 = vadd.f32 %v2601_v24, %v1193_v4  ;;  %v1222_v11 = vmax.f32 %v1202_v31, 0.0  ;;  %v1267_v28 = vsel %vm1251_vm12, %v1217_v7, -1e+30  ;;  %v1397_v31 = vsub.s32 0, %v2586_v15 }
 0x47b   : > { %v1834_v12 = vpop.f32.mrf.mxu0  ;;  %v1279_v47 = vmax.f32 %v1275_v38, %v1267_v28 }
 0x47c   : > { %v1220_v16 = vmax.f32 %v1194_v8, 0.0  ;;  %v1205_v17 = vadd.f32 %v1834_v12, %v2601_v24  ;;  %v1272_v33 = vsel %vm1256_vm13, %v1222_v11, -1e+30 }
 0x47d   : > { %v1196_v23 = vpop.f32.mrf.mxu0  ;;  %v1284_v50 = vmax.f32 %v1280_v46, %v1272_v33 }
 0x47e   : > { %v1223_v29 = vmax.f32 %v1205_v17, 0.0  ;;  %v1197_v37 = vadd.f32 %v2601_v24, %v1196_v23  ;;  %v1270_v44 = vsel %vm1254_vm14, %v1220_v16, -1e+30 }
 0x47f   : > { %v1282_v51 = vmax.f32 %v1278_v40, %v1270_v44 }
 0x480   : > { %v1273_v39 = vsel %vm1257_vm15, %v1223_v29, -1e+30  ;;  %v1221_v45 = vmax.f32 %v1197_v37, 0.0 }
 0x481   : > { %v1285_v49 = vmax.f32 %v1281_v41, %v1273_v39 }
 0x482   : > { %v1271_v24 = vsel %vm1255_vm0, %v1221_v45, -1e+30 }
 0x483   : > { %v1283_v52 = vmax.f32 %v1279_v47, %v1271_v24  ;;  %v1287_v53 = vmax.f32 %v1284_v50, %v1285_v49 }
 0x485   : > { %v1286_v43 = vmax.f32 %v1282_v51, %v1283_v52 }
 0x487   : > { %v1288_v54 = vmax.f32 %v1286_v43, %v1287_v53 }
 0x489   : > { %v1289_v55 = vrot.slane %v1288_v54, 4 }
 0x48b   : > { %v1290_v48 = vmax.f32 %v1288_v54, %v1289_v55 }
 0x48d   : > { %v1291_v56 = vrot.slane %v1290_v48, 2 }
 0x48f   : > { %v1292_v57 = vmax.f32 %v1290_v48, %v1291_v56 }
 0x491   : > { %v1293_v42 = vrot.slane %v1292_v57, 1 }
 0x493   : > { %v1294_v58 = vmax.f32 %v1292_v57, %v1293_v42 }
 0x495   : > { %1868 = vmatmul.mubr.f32.vlgmr.msra.gmra.mxu1 %v1294_v58 }
 0x555   : > { %v1378_v20 = vpop.f32.mrf.mxu1 }
 0x556   : > { %v1379_v60 = vadd.f32 %v1378_v20, %v1311_v59 }
 0x557   : > { %v1869_v61 = vpop.f32.mrf.mxu1 }
 0x558   : > { %v1383_v62 = vsel %vm1382_vm1, %v1379_v60, -inf }
 0x559   : > { %1384 = vmax.xlane.f32.xlu0 %v1383_v62 }
 0x5e2   : > { %v1385_v63 = vpop.xlane.xlu0 %1384 }
 0x5e3   : > { %v1386_v0 = vsub.f32 %v1379_v60, %v1385_v63 }
 0x5e5   : > { %v1387_v1 = vmul.f32 1.442695, %v1386_v0 }
 0x5e7   : > { %2015 = vpow2.f32 %v1387_v1 }
 0x5f4   : > { %v2016_v2 = vpop.eup %2015 }
 0x5f5   : > { %v1389_v26 = vsel %vm1382_vm1, %v2016_v2, 0.0 }
 0x5f6   : > { %1390 = vadd.xlane.f32.xlu0 %v1389_v26 }
 0x67f   : > { %v1391_v27 = vpop.xlane.xlu0 %1390 }
 0x680   : > { %2017 = vlog2.f32 %v1391_v27 }
 0x68d   : > { %v2018_v30 = vpop.eup %2017 }
 0x68e   : > { %v1393_v34 = vmul.f32 0.6931472, %v2018_v30 }
 0x690   : > { %v1394_v35 = vsub.f32 %v1386_v0, %v1393_v34 }
 0x692   : > { %v1398_v36 = vrot.slane %v1394_v35, %v1397_v31 }
 0x694   : > { %1399 = vst [vmem:[%s411_s14] sm:$0xff] %v1398_v36 }
 0x695   : > { %2174 = shalt.err (!%p2171_p6)
}
 0x696   : > { %s2175_s17 = scalar_lea.hbm %s1412_s20, 128  ;;  %s2179_s10 = scalar_lea.hbm %s2761_s9, 256 }
 0x697   : > { %p2176_p7 = scmp.ne.s32.totalorder %s1412_s20, %s2175_s17  ;;  %p2180_p2 = scmp.lt.s32.totalorder %s1412_s20, %s2761_s9 }
 0x698   : > { %p2181_p3 = scmp.lt.s32.totalorder %s2179_s10, %s2175_s17 }
 0x699   : > { %p2177_p5 = pnand %p2176_p7, %p2797_p13 }
 0x69a   : > { %p2182_p12 = por %p2181_p3, %p2180_p2 }
 0x69b   : > { %p2178_p8 = pneg %p2177_p5 }
 0x69d   : > { %p2183_p9 = pnand %p2182_p12, %p2178_p8 }
 0x69f   : > { %2186 = shalt.err (!%p2183_p9)
}
 0x6a0   : > { %1886 = dma.vmem_to_hbm [thread:$0]  (%p2797_p13), %s1415_s26, 128, %s1412_s20, %s1401_s5  }
 0x6a1 PF: > { %s1426_s1 = sand.u32 1, %s2227_s12   ;;  %p2798_p0 = scmp.ne.s32.totalorder %s2776_s18, 0 }
 0x6a2   : > { %p2799_p11 = scmp.ge.s32.totalorder %s2239_s15, 2  ;;  %s1427_s7 = scalar_lea.sflag [#allocation6], %s1426_s1 }
 0x6a4   : > { %p1906_p10 = pnand %p2799_p11, %p2798_p0 }
 0x6a6   : > { %p1907_p1 = pneg %p1906_p10 }
 0x6a8   : > { %2222 = dma.done.wait (%p1907_p1), %s1427_s7, 128  }
 0x6a9   : > { %2224 = vsyncadd (%p1907_p1), %s1427_s7, 4294967168  ;;  %s2800_s27 = sld [smem:[#allocation20_spill]]  ;;  %p30_p4 = scmp.ge.s32.totalorder %s2396_s30, 4  }
 0x6aa   : > { %s2801_s14 = sld [smem:[#allocation21_spill]]  ;;  %s2802_s12 = smov %s2231_s13 }
 0x6ab   : > { %s2804_s15 = smov %s2396_s30  ;;  %32 = sbr.rel (!%p30_p4) target bundleno = 17 (0x11), region = 122 }
 0x6af   : > { %s2803_s13 = smov %s2800_s27 }
 0x6b0   :  { %1432 = vsyncpa [#allocation5], 1 }
 0x6b1   :  { %1434 = vsyncpa [#allocation5 + $0x1], 1 }
 0x6b2   :  { %1435 = vsyncpa [#allocation8], 1 }
 0x6b3   :  { %1437 = vsyncpa [#allocation8 + $0x1], 1 }
 0x6b4   :  { %1438 = vsyncpa [#allocation11], 1 }
 0x6b5   :  { %1439 = vsyncpa [#allocation6], 1 }
 0x6b6   :  { %1441 = vsyncpa [#allocation6 + $0x1], 1 }

</bundles_post_ra>
